<compile_context>
chip_gen: v7x
topology: tpu7x:2x2x1
jax: 0.10.0
libtpu: 0.0.40
codegen_flags: <defaults>
</compile_context>

<pallas_src>
import jax
import jax.numpy as jnp
from jax.experimental import pallas as pl
from jax.experimental.pallas import tpu as pltpu

_BN_EPS = 1e-5
_LANE = 128


def _round_up(x, m):
    return ((x + m - 1) // m) * m


def _pad2(a, rows, cols):
    return jnp.pad(a, ((0, rows - a.shape[0]), (0, cols - a.shape[1])))


# ---------------------------------------------------------------------------
# Kernels
# ---------------------------------------------------------------------------
def _make_first_kernel(tr, n_valid, needs_mask):
    """First conv layer, latent term pre-projected per batch.

    refs: pts (tr, 3), latproj (1, C1), w_pts (3, C1)
          -> z (tr, C1) bf16, sum (1, C1), sumsq (1, C1)   [sum/ssq per-batch resident]
    """

    def kernel(pts_ref, latproj_ref, w_ref, z_ref, sum_ref, ssq_ref):
        i = pl.program_id(1)

        @pl.when(i == 0)
        def _():
            sum_ref[...] = jnp.zeros_like(sum_ref)
            ssq_ref[...] = jnp.zeros_like(ssq_ref)

        pts = pts_ref[...].astype(jnp.float32)            # (tr, 3)
        w = w_ref[...]                                    # (3, C1) f32
        # K=3 contraction as three rank-1 VPU updates (avoids a degenerate MXU pass).
        z = (pts[:, 0:1] * w[0:1, :]
             + pts[:, 1:2] * w[1:2, :]
             + pts[:, 2:3] * w[2:3, :])
        z = z + latproj_ref[...]                          # (1, C1) broadcast per image

        if needs_mask:
            # Mask padded rows out of the batch statistics.
            row = i * tr + jax.lax.broadcasted_iota(jnp.int32, (tr, 1), 0)
            zv = z * (row < n_valid).astype(jnp.float32)
        else:
            zv = z
        sum_ref[...] += jnp.sum(zv, axis=0, keepdims=True)
        ssq_ref[...] += jnp.sum(zv * z, axis=0, keepdims=True)

        z_ref[...] = z.astype(z_ref.dtype)

    return kernel


def _make_mid_kernel(tr, n_valid, needs_mask):
    """Fused: normalize(prev BN) -> ReLU -> conv_k matmul -> stats of conv_k output.

    refs: z_prev (tr, Cin) bf16, scale (1, Cin), shift (1, Cin), w (Cin, Cout) bf16
          -> z (tr, Cout) bf16, sum (1, Cout), sumsq (1, Cout)   [per-batch resident]
    """

    def kernel(z_ref, scale_ref, shift_ref, w_ref, zo_ref, sum_ref, ssq_ref):
        i = pl.program_id(1)

        @pl.when(i == 0)
        def _():
            sum_ref[...] = jnp.zeros_like(sum_ref)
            ssq_ref[...] = jnp.zeros_like(ssq_ref)

        h = z_ref[...].astype(jnp.float32)
        h = h * scale_ref[...] + shift_ref[...]           # folded BN (f32)
        h = jnp.maximum(h, 0.0)                           # ReLU
        z = jnp.dot(h.astype(jnp.bfloat16), w_ref[...],
                    preferred_element_type=jnp.float32)   # MXU, bf16 in / f32 acc

        if needs_mask:
            row = i * tr + jax.lax.broadcasted_iota(jnp.int32, (tr, 1), 0)
            zv = z * (row < n_valid).astype(jnp.float32)
        else:
            zv = z
        sum_ref[...] += jnp.sum(zv, axis=0, keepdims=True)
        ssq_ref[...] += jnp.sum(zv * z, axis=0, keepdims=True)

        zo_ref[...] = z.astype(zo_ref.dtype)

    return kernel


def _make_last_kernel(final_act):
    """Fused: normalize(prev BN) -> ReLU -> final conv (+bias) -> tanh/sigmoid.

    Output is lane-dense (Cout padded to 128); real columns sliced in the wrapper.
    """

    def kernel(z_ref, scale_ref, shift_ref, w_ref, b_ref, o_ref):
        h = z_ref[...].astype(jnp.float32)
        h = h * scale_ref[...] + shift_ref[...]
        h = jnp.maximum(h, 0.0)
        o = jnp.dot(h.astype(jnp.bfloat16), w_ref[...],
                    preferred_element_type=jnp.float32) + b_ref[...]
        if final_act == "tanh":
            o = jnp.tanh(o)
        else:  # sigmoid: exp on EUP, exact reciprocal
            o = pl.reciprocal(1.0 + jnp.exp(-o))
        o_ref[...] = o.astype(o_ref.dtype)

    return kernel


# ---------------------------------------------------------------------------
# Per-layer pallas_call wrappers (grid = (B, N_pad // tr))
# ---------------------------------------------------------------------------
def _first_pass(pts_pad, latproj, w_pts, *, tr, n_valid):
    B, n_pad, _ = pts_pad.shape
    C = latproj.shape[-1]
    lat3 = latproj.reshape(B, 1, C)
    return pl.pallas_call(
        _make_first_kernel(tr, n_valid, n_pad != n_valid),
        grid_spec=pltpu.PrefetchScalarGridSpec(
            num_scalar_prefetch=0,
            grid=(B, n_pad // tr),
            in_specs=(
                pl.BlockSpec((None, tr, 3), lambda b, i: (b, i, 0)),
                pl.BlockSpec((None, 1, C), lambda b, i: (b, 0, 0)),
                pl.BlockSpec((3, C), lambda b, i: (0, 0)),
            ),
            out_specs=(
                pl.BlockSpec((None, tr, C), lambda b, i: (b, i, 0)),
                pl.BlockSpec((None, 1, C), lambda b, i: (b, 0, 0)),
                pl.BlockSpec((None, 1, C), lambda b, i: (b, 0, 0)),
            ),
        ),
        out_shape=(
            jax.ShapeDtypeStruct((B, n_pad, C), jnp.bfloat16),
            jax.ShapeDtypeStruct((B, 1, C), jnp.float32),
            jax.ShapeDtypeStruct((B, 1, C), jnp.float32),
        ),
        compiler_params=pltpu.CompilerParams(
            dimension_semantics=("parallel", "arbitrary")),
    )(pts_pad, lat3, w_pts)


def _mid_pass(z, scale, shift, w_bf16, *, tr, n_valid):
    B, n_pad, cin = z.shape
    cout = w_bf16.shape[1]
    return pl.pallas_call(
        _make_mid_kernel(tr, n_valid, n_pad != n_valid),
        grid_spec=pltpu.PrefetchScalarGridSpec(
            num_scalar_prefetch=0,
            grid=(B, n_pad // tr),
            in_specs=(
                pl.BlockSpec((None, tr, cin), lambda b, i: (b, i, 0)),
                pl.BlockSpec((1, cin), lambda b, i: (0, 0)),
                pl.BlockSpec((1, cin), lambda b, i: (0, 0)),
                pl.BlockSpec((cin, cout), lambda b, i: (0, 0)),
            ),
            out_specs=(
                pl.BlockSpec((None, tr, cout), lambda b, i: (b, i, 0)),
                pl.BlockSpec((None, 1, cout), lambda b, i: (b, 0, 0)),
                pl.BlockSpec((None, 1, cout), lambda b, i: (b, 0, 0)),
            ),
        ),
        out_shape=(
            jax.ShapeDtypeStruct((B, n_pad, cout), jnp.bfloat16),
            jax.ShapeDtypeStruct((B, 1, cout), jnp.float32),
            jax.ShapeDtypeStruct((B, 1, cout), jnp.float32),
        ),
        compiler_params=pltpu.CompilerParams(
            dimension_semantics=("parallel", "arbitrary")),
    )(z, scale, shift, w_bf16)


def _last_pass(z, scale, shift, w_bf16, bias, final_act, *, tr):
    B, n_pad, cin = z.shape
    cout = w_bf16.shape[1]
    return pl.pallas_call(
        _make_last_kernel(final_act),
        grid_spec=pltpu.PrefetchScalarGridSpec(
            num_scalar_prefetch=0,
            grid=(B, n_pad // tr),
            in_specs=(
                pl.BlockSpec((None, tr, cin), lambda b, i: (b, i, 0)),
                pl.BlockSpec((1, cin), lambda b, i: (0, 0)),
                pl.BlockSpec((1, cin), lambda b, i: (0, 0)),
                pl.BlockSpec((cin, cout), lambda b, i: (0, 0)),
                pl.BlockSpec((1, cout), lambda b, i: (0, 0)),
            ),
            out_specs=pl.BlockSpec((None, tr, cout), lambda b, i: (b, i, 0)),
        ),
        out_shape=jax.ShapeDtypeStruct((B, n_pad, cout), jnp.float32),
        compiler_params=pltpu.CompilerParams(
            dimension_semantics=("parallel", "parallel")),
    )(z, scale, shift, w_bf16, bias)


# ---------------------------------------------------------------------------
# Point-net runner (DeformNet / Estimator / Refiner share this structure)
# ---------------------------------------------------------------------------
def _run_point_net(layers, lat, pts_pad, *, n_valid, tr, final_act):
    B = pts_pad.shape[0]
    count = float(B * n_valid)

    # Latent term of conv1 computed once per image (tiny: (B,D)@(D,C1)).
    latproj = jnp.dot(lat, layers[0]["w_lat"])             # (B, C1p) f32

    z, s, ss = _first_pass(pts_pad, latproj, layers[0]["w_pts"],
                           tr=tr, n_valid=n_valid)
    out = None
    for idx in range(1, len(layers)):
        prev = layers[idx - 1]
        s_tot = jnp.sum(s, axis=0)                         # (1, C): reduce per-batch partials
        ss_tot = jnp.sum(ss, axis=0)
        mean = s_tot / count
        var = jnp.maximum(ss_tot / count - mean * mean, 0.0)   # biased (train) batch var
        scale = prev["gamma"] * jax.lax.rsqrt(var + _BN_EPS)
        shift = prev["beta"] - mean * scale
        if idx < len(layers) - 1:
            z, s, ss = _mid_pass(z, scale, shift, layers[idx]["w"],
                                 tr=tr, n_valid=n_valid)
        else:
            out = _last_pass(z, scale, shift, layers[idx]["w"], layers[idx]["b"],
                             final_act, tr=tr)
    return out                                             # (B, N_pad, 128) f32


# ---------------------------------------------------------------------------
# Encoder stub (plain JAX).
# TODO(synk): resnet_3D.resnet50_3D is not provided in the source module; it is
# replaced by a deterministic GAP + linear projection with the same (B, D) latent
# shape. Kept out of Pallas: it is a single tiny matmul (pure launch overhead).
# ---------------------------------------------------------------------------
def _encode(enc, x):
    x3 = x[:, :3, :, :]
    pooled = jnp.mean(x3, axis=(2, 3))                     # (B, 3)
    return jnp.dot(pooled, enc["w"]) + enc["b"]            # (B, D)


# ---------------------------------------------------------------------------
# Parameter construction (shapes match the PyTorch module; channel dims padded
# to multiples of 128 with zeros, which is mathematically exact here)
# ---------------------------------------------------------------------------
def _uniform(key, shape, fan_in):
    s = 1.0 / (fan_in ** 0.5)
    return jax.random.uniform(key, shape, jnp.float32, -s, s)


def _init_point_net(key, dims):
    layers = []
    keys = jax.random.split(key, 2 * len(dims))
    for idx, (cin, cout) in enumerate(dims):
        cout_p = _round_up(cout, _LANE)
        wk, bk = keys[2 * idx], keys[2 * idx + 1]
        w = _uniform(wk, (cin, cout), cin)
        is_last = idx == len(dims) - 1
        if idx == 0:
            lyr = {
                "w_pts": _pad2(w[:3], 3, cout_p),                        # f32 (VPU)
                "w_lat": _pad2(w[3:], cin - 3, cout_p),                  # f32 (host matmul)
            }
        else:
            cin_p = _round_up(cin, _LANE)
            lyr = {"w": _pad2(w, cin_p, cout_p).astype(jnp.bfloat16)}    # bf16 (MXU)
        if is_last:
            lyr["b"] = _pad2(_uniform(bk, (1, cout), cin), 1, cout_p)
        else:
            # Hidden conv bias dropped: cancelled exactly by BN mean subtraction.
            lyr["gamma"] = jnp.ones((1, cout_p), jnp.float32)
            lyr["beta"] = jnp.zeros((1, cout_p), jnp.float32)
        layers.append(lyr)
    return layers


def _deform_dims(b0):
    return [(b0, b0), (b0, b0 // 2 + b0 // 4), (b0 // 2 + b0 // 4, b0 // 2),
            (b0 // 2, b0 // 4), (b0 // 4, 3)]


def _estimator_dims(b0):
    return [(b0, b0), (b0, b0 // 2), (b0 // 2, b0 // 4), (b0 // 4, 1)]


def _refiner_dims(b0):
    return [(b0, b0), (b0, b0 // 2), (b0 // 2, b0 // 4), (b0 // 4, 2)]


def init_svr_tmnet(key, bottleneck_size):
    b0 = 3 + bottleneck_size
    keys = jax.random.split(key, 6)
    enc_scale = 1.0 / (3.0 ** 0.5)
    return {
        "enc": {
            "w": jax.random.uniform(keys[0], (3, bottleneck_size), jnp.float32,
                                    -enc_scale, enc_scale),
            "b": jnp.zeros((1, bottleneck_size), jnp.float32),
        },
        "decoder": _init_point_net(keys[1], _deform_dims(b0)),
        "decoder2": _init_point_net(keys[2], _deform_dims(b0)),
        "estimate": _init_point_net(keys[3], _estimator_dims(b0)),
        "estimate2": _init_point_net(keys[4], _estimator_dims(b0)),
        "refine": _init_point_net(keys[5], _refiner_dims(b0)),
    }


# ---------------------------------------------------------------------------
# SVR_TMNet forward
# ---------------------------------------------------------------------------
def svr_tmnet_forward(params, x, points, vector1=None, vector2=None,
                      mode="deform1", row_tile=1024):
    lat = _encode(params["enc"], x)                        # (B, D)

    # NOTE: mirrors torch's `if points.size(1) != 3` check (ambiguous when N == 3).
    if points.shape[1] != 3:
        points = jnp.transpose(points, (0, 2, 1))          # -> (B, 3, N)
    pts_cl = jnp.transpose(points, (0, 2, 1))              # (B, N, 3) channels-last
    B, N, _ = pts_cl.shape

    # Row tile: multiple of 16 (bf16 sublane packing), sized so double-buffered
    # bf16 tiles fit the default scoped VMEM limit on all of v5e/v6e/v7x.
    tr = _round_up(min(row_tile, N), 16)
    n_pad = _round_up(N, tr)
    pts_pad = jnp.pad(pts_cl, ((0, 0), (0, n_pad - N), (0, 0)))

    def run(net_key, act):
        return _run_point_net(params[net_key], lat, pts_pad,
                              n_valid=N, tr=tr, final_act=act)

    if mode == "deform1":
        return run("decoder", "tanh")[:, :N, :3]
    if mode == "deform2":
        return run("decoder2", "tanh")[:, :N, :3] + pts_cl
    if mode == "estimate":
        return run("estimate", "sigmoid")[:, :N, 0]
    if mode == "estimate2":
        return run("estimate2", "sigmoid")[:, :N, 0]
    if mode == "refine":
        r = run("refine", "tanh")[:, :N, :2]
        v1 = jnp.transpose(vector1, (0, 2, 1))             # (B, N, 3)
        v2 = jnp.transpose(vector2, (0, 2, 1))
        return r[:, :, 0:1] * v1 + r[:, :, 1:2] * v2 + pts_cl
    return None


if __name__ == "__main__":
    key = jax.random.PRNGKey(0)
    k_img, k_pts, k_par = jax.random.split(key, 3)

    B, C, H, W, N = 2, 4, 16, 16, 512
    bottleneck = 125  # => 3 + 125 = 128 point-MLP input channels (lane aligned)

    x = jax.random.normal(k_img, (B, C, H, W), jnp.float32)
    points = jax.random.uniform(k_pts, (B, 3, N), jnp.float32, -1.0, 1.0)
    params = init_svr_tmnet(k_par, bottleneck)

    # small row tile so the demo exercises a multi-step (B, N//tr) grid
    out1 = svr_tmnet_forward(params, x, points, mode="deform1", row_tile=128)
    out1 = jax.block_until_ready(out1)
    assert out1.shape == (B, N, 3), out1.shape
    assert bool(jnp.all(jnp.isfinite(out1)))

    out2 = svr_tmnet_forward(params, x, points, mode="estimate", row_tile=128)
    out2 = jax.block_until_ready(out2)
    assert out2.shape == (B, N), out2.shape
    assert bool(jnp.all(jnp.isfinite(out2)))

    print("KERNEL_OK")
</pallas_src>

<mosaic_0001>
module attributes {stable_mosaic.version = 11 : i64} {
  func.func @kernel(%arg0: i32, %arg1: i32, %arg2: memref<1x128x3xf32, #tpu.memory_space<vmem>>, %arg3: memref<1x1x128xf32, #tpu.memory_space<vmem>>, %arg4: memref<3x128xf32, #tpu.memory_space<vmem>>, %arg5: memref<1x128x128xbf16, #tpu.memory_space<vmem>>, %arg6: memref<1x1x128xf32, #tpu.memory_space<vmem>>, %arg7: memref<1x1x128xf32, #tpu.memory_space<vmem>>) attributes {dimension_semantics = [#tpu.dimension_semantics<parallel>, #tpu.dimension_semantics<arbitrary>], iteration_bounds = array<i64: 2, 4>, scalar_prefetch = 0 : i64, scratch_operands = 0 : i64, tpu.core_type = #tpu.core_type<tc>, window_params = [{transform_indices = @transform_0, window_bounds = array<i64: 1, 128, 3>}, {transform_indices = @transform_1, window_bounds = array<i64: 1, 1, 128>}, {pipeline_mode = #tpu.pipeline_mode<synchronous>, transform_indices = @transform_2, window_bounds = array<i64: 3, 128>}, {transform_indices = @transform_3, window_bounds = array<i64: 1, 128, 128>}, {transform_indices = @transform_4, window_bounds = array<i64: 1, 1, 128>}, {transform_indices = @transform_5, window_bounds = array<i64: 1, 1, 128>}]} {
    %c0_i32 = arith.constant 0 : i32
    %0 = arith.cmpi eq, %arg1, %c0_i32 : i32
    %1 = arith.extui %0 : i1 to i32
    %c0_i32_0 = arith.constant 0 : i32
    %2 = arith.cmpi ne, %1, %c0_i32_0 : i32
    scf.if %2 {
      %cst_24 = arith.constant 0.000000e+00 : f32
      %48 = vector.broadcast %cst_24 : f32 to vector<1x128xf32>
      %c0_25 = arith.constant 0 : index
      %c0_26 = arith.constant 0 : index
      %c0_27 = arith.constant 0 : index
      %49 = vector.load %arg6[%c0_25, %c0_26, %c0_27] : memref<1x1x128xf32, #tpu.memory_space<vmem>>, vector<1x1x128xf32>
      %50 = vector.shape_cast %49 : vector<1x1x128xf32> to vector<1x128xf32>
      %51 = vector.shape_cast %48 : vector<1x128xf32> to vector<1x1x128xf32>
      tpu.vector_store %arg6[%c0_25, %c0_26, %c0_27], %51 {strides = array<i32>} : memref<1x1x128xf32, #tpu.memory_space<vmem>>, vector<1x1x128xf32>,
      %cst_28 = arith.constant 0.000000e+00 : f32
      %52 = vector.broadcast %cst_28 : f32 to vector<1x128xf32>
      %c0_29 = arith.constant 0 : index
      %c0_30 = arith.constant 0 : index
      %c0_31 = arith.constant 0 : index
      %53 = vector.load %arg7[%c0_29, %c0_30, %c0_31] : memref<1x1x128xf32, #tpu.memory_space<vmem>>, vector<1x1x128xf32>
      %54 = vector.shape_cast %53 : vector<1x1x128xf32> to vector<1x128xf32>
      %55 = vector.shape_cast %52 : vector<1x128xf32> to vector<1x1x128xf32>
      tpu.vector_store %arg7[%c0_29, %c0_30, %c0_31], %55 {strides = array<i32>} : memref<1x1x128xf32, #tpu.memory_space<vmem>>, vector<1x1x128xf32>,
    } else {
    }
    %c0 = arith.constant 0 : index
    %c0_1 = arith.constant 0 : index
    %c0_2 = arith.constant 0 : index
    %3 = vector.load %arg2[%c0, %c0_1, %c0_2] : memref<1x128x3xf32, #tpu.memory_space<vmem>>, vector<1x128x3xf32>
    %4 = vector.shape_cast %3 : vector<1x128x3xf32> to vector<128x3xf32>
    %c0_3 = arith.constant 0 : index
    %c0_4 = arith.constant 0 : index
    %5 = vector.load %arg4[%c0_3, %c0_4] : memref<3x128xf32, #tpu.memory_space<vmem>>, vector<3x128xf32>
    %6 = vector.extract_strided_slice %4 {offsets = [0, 0], sizes = [128, 1], strides = [1, 1]} : vector<128x3xf32> to vector<128x1xf32>
    %7 = vector.extract_strided_slice %5 {offsets = [0, 0], sizes = [1, 128], strides = [1, 1]} : vector<3x128xf32> to vector<1x128xf32>
    %8 = vector.broadcast %6 : vector<128x1xf32> to vector<128x128xf32>
    %9 = vector.broadcast %7 : vector<1x128xf32> to vector<128x128xf32>
    %10 = arith.mulf %8, %9 : vector<128x128xf32>
    %11 = vector.extract_strided_slice %4 {offsets = [0, 1], sizes = [128, 1], strides = [1, 1]} : vector<128x3xf32> to vector<128x1xf32>
    %12 = vector.extract_strided_slice %5 {offsets = [1, 0], sizes = [1, 128], strides = [1, 1]} : vector<3x128xf32> to vector<1x128xf32>
    %13 = vector.broadcast %11 : vector<128x1xf32> to vector<128x128xf32>
    %14 = vector.broadcast %12 : vector<1x128xf32> to vector<128x128xf32>
    %15 = arith.mulf %13, %14 : vector<128x128xf32>
    %16 = arith.addf %10, %15 : vector<128x128xf32>
    %17 = vector.extract_strided_slice %4 {offsets = [0, 2], sizes = [128, 1], strides = [1, 1]} : vector<128x3xf32> to vector<128x1xf32>
    %18 = vector.extract_strided_slice %5 {offsets = [2, 0], sizes = [1, 128], strides = [1, 1]} : vector<3x128xf32> to vector<1x128xf32>
    %19 = vector.broadcast %17 : vector<128x1xf32> to vector<128x128xf32>
    %20 = vector.broadcast %18 : vector<1x128xf32> to vector<128x128xf32>
    %21 = arith.mulf %19, %20 : vector<128x128xf32>
    %22 = arith.addf %16, %21 : vector<128x128xf32>
    %c0_5 = arith.constant 0 : index
    %c0_6 = arith.constant 0 : index
    %c0_7 = arith.constant 0 : index
    %23 = vector.load %arg3[%c0_5, %c0_6, %c0_7] : memref<1x1x128xf32, #tpu.memory_space<vmem>>, vector<1x1x128xf32>
    %24 = vector.shape_cast %23 : vector<1x1x128xf32> to vector<1x128xf32>
    %25 = vector.broadcast %24 : vector<1x128xf32> to vector<128x128xf32>
    %26 = arith.addf %22, %25 : vector<128x128xf32>
    %c0_8 = arith.constant 0 : index
    %c0_9 = arith.constant 0 : index
    %c0_10 = arith.constant 0 : index
    %27 = vector.load %arg6[%c0_8, %c0_9, %c0_10] : memref<1x1x128xf32, #tpu.memory_space<vmem>>, vector<1x1x128xf32>
    %28 = vector.shape_cast %27 : vector<1x1x128xf32> to vector<1x128xf32>
    %cst = arith.constant dense<0.000000e+00> : vector<128xf32>
    %29 = vector.multi_reduction <add>, %26, %cst [0] : vector<128x128xf32> to vector<128xf32>
    %30 = vector.shape_cast %29 : vector<128xf32> to vector<1x128xf32>
    %31 = arith.addf %28, %30 : vector<1x128xf32>
    %c0_11 = arith.constant 0 : index
    %c0_12 = arith.constant 0 : index
    %c0_13 = arith.constant 0 : index
    %32 = vector.load %arg6[%c0_11, %c0_12, %c0_13] : memref<1x1x128xf32, #tpu.memory_space<vmem>>, vector<1x1x128xf32>
    %33 = vector.shape_cast %32 : vector<1x1x128xf32> to vector<1x128xf32>
    %34 = vector.shape_cast %31 : vector<1x128xf32> to vector<1x1x128xf32>
    tpu.vector_store %arg6[%c0_11, %c0_12, %c0_13], %34 {strides = array<i32>} : memref<1x1x128xf32, #tpu.memory_space<vmem>>, vector<1x1x128xf32>,
    %c0_14 = arith.constant 0 : index
    %c0_15 = arith.constant 0 : index
    %c0_16 = arith.constant 0 : index
    %35 = vector.load %arg7[%c0_14, %c0_15, %c0_16] : memref<1x1x128xf32, #tpu.memory_space<vmem>>, vector<1x1x128xf32>
    %36 = vector.shape_cast %35 : vector<1x1x128xf32> to vector<1x128xf32>
    %37 = arith.mulf %26, %26 : vector<128x128xf32>
    %cst_17 = arith.constant dense<0.000000e+00> : vector<128xf32>
    %38 = vector.multi_reduction <add>, %37, %cst_17 [0] : vector<128x128xf32> to vector<128xf32>
    %39 = vector.shape_cast %38 : vector<128xf32> to vector<1x128xf32>
    %40 = arith.addf %36, %39 : vector<1x128xf32>
    %c0_18 = arith.constant 0 : index
    %c0_19 = arith.constant 0 : index
    %c0_20 = arith.constant 0 : index
    %41 = vector.load %arg7[%c0_18, %c0_19, %c0_20] : memref<1x1x128xf32, #tpu.memory_space<vmem>>, vector<1x1x128xf32>
    %42 = vector.shape_cast %41 : vector<1x1x128xf32> to vector<1x128xf32>
    %43 = vector.shape_cast %40 : vector<1x128xf32> to vector<1x1x128xf32>
    tpu.vector_store %arg7[%c0_18, %c0_19, %c0_20], %43 {strides = array<i32>} : memref<1x1x128xf32, #tpu.memory_space<vmem>>, vector<1x1x128xf32>,
    %44 = arith.truncf %26 : vector<128x128xf32> to vector<128x128xbf16>
    %c0_21 = arith.constant 0 : index
    %c0_22 = arith.constant 0 : index
    %c0_23 = arith.constant 0 : index
    %45 = vector.load %arg5[%c0_21, %c0_22, %c0_23] : memref<1x128x128xbf16, #tpu.memory_space<vmem>>, vector<1x128x128xbf16>
    %46 = vector.shape_cast %45 : vector<1x128x128xbf16> to vector<128x128xbf16>
    %47 = vector.shape_cast %44 : vector<128x128xbf16> to vector<1x128x128xbf16>
    tpu.vector_store %arg5[%c0_21, %c0_22, %c0_23], %47 {strides = array<i32>} : memref<1x128x128xbf16, #tpu.memory_space<vmem>>, vector<1x128x128xbf16>,
    return
  }
  func.func @transform_0(%arg0: i32, %arg1: i32) -> (i32, i32, i32) {
    %c0_i32 = arith.constant 0 : i32
    %c0_i32_0 = arith.constant 0 : i32
    return %arg0, %arg1, %c0_i32 : i32, i32, i32
  }
  func.func @transform_1(%arg0: i32, %arg1: i32) -> (i32, i32, i32) {
    %c0_i32 = arith.constant 0 : i32
    %c0_i32_0 = arith.constant 0 : i32
    %c0_i32_1 = arith.constant 0 : i32
    return %arg0, %c0_i32, %c0_i32_0 : i32, i32, i32
  }
  func.func @transform_2(%arg0: i32, %arg1: i32) -> (i32, i32) {
    %c0_i32 = arith.constant 0 : i32
    %c0_i32_0 = arith.constant 0 : i32
    %c0_i32_1 = arith.constant 0 : i32
    return %c0_i32, %c0_i32_0 : i32, i32
  }
  func.func @transform_3(%arg0: i32, %arg1: i32) -> (i32, i32, i32) {
    %c0_i32 = arith.constant 0 : i32
    %c0_i32_0 = arith.constant 0 : i32
    return %arg0, %arg1, %c0_i32 : i32, i32, i32
  }
  func.func @transform_4(%arg0: i32, %arg1: i32) -> (i32, i32, i32) {
    %c0_i32 = arith.constant 0 : i32
    %c0_i32_0 = arith.constant 0 : i32
    %c0_i32_1 = arith.constant 0 : i32
    return %arg0, %c0_i32, %c0_i32_0 : i32, i32, i32
  }
  func.func @transform_5(%arg0: i32, %arg1: i32) -> (i32, i32, i32) {
    %c0_i32 = arith.constant 0 : i32
    %c0_i32_0 = arith.constant 0 : i32
    %c0_i32_1 = arith.constant 0 : i32
    return %arg0, %c0_i32, %c0_i32_0 : i32, i32, i32
  }
}

</mosaic_0001>

<bundles_post_ra>
// kernel: tpu_custom_call.1
= control target key start
LH: loop header
LB: loop body
LE: loop exit
PB: predicated region body
PF: predicated region fallthrough
CT: control target
= control target key end

     0   :  { %11 = vsyncpa [#allocation3], 0  ;;  %s1886_s0 = inlined_call_operand.vmem [shape: f32[2,512,3], index: 0, kind: input, shape index: {}]   ;;  %s1887_s1 = inlined_call_operand.vmem [shape: f32[2,1,128], index: 1, kind: input, shape index: {}]   ;;  %s1888_s2 = inlined_call_operand.vmem [shape: f32[3,128], index: 2, kind: input, shape index: {}]   ;;  %s1889_s3 = inlined_call_operand.hbm [shape: bf16[2,512,128], index: 3, kind: output, shape index: {0}]   ;;  %s1890_s4 = inlined_call_operand.hbm [shape: f32[2,1,128], index: 4, kind: output, shape index: {1}]   ;;  %s1891_s5 = inlined_call_operand.hbm [shape: f32[2,1,128], index: 5, kind: output, shape index: {2}]  }
   0x1   :  { %13 = vsyncpa [#allocation3 + $0x1], 0 }
   0x2   :  { %14 = vsyncpa [#allocation5], 0 }
   0x3   :  { %16 = vsyncpa [#allocation5 + $0x1], 0  ;;  %s1404_s18 = smov 0   ;;  %s1406_s19 = smov 0  }
   0x4   :  { %s1408_s20 = smov 0   ;;  %s1410_s21 = smov 0  }
   0x5   :  { %s1412_s22 = smov 0   ;;  %s1414_s23 = smov 0  }
   0x6   :  { %s1416_s24 = smov 0   ;;  %s1418_s25 = smov 0  }
   0x7   :  { %s1420_s26 = smov 0   ;;  %s1422_s27 = smov 0  }
   0x8   :  { %s1424_s28 = smov 0  }
   0x9 LB: > { %1903 = sst [smem:[#allocation9_spill]] %s1327_s19  ;;  %s1893_s29 = sadd.s32 4294967295, %s1363_s28   ;;  %s1363_s28 = sphi %s1424_s28, %s22_s28   ;;  %s1359_s27 = sphi %s1422_s27, %s1931_s27   ;;  %s1355_s26 = sphi %s1420_s26, %s1930_s26   ;;  %s1351_s25 = sphi %s1418_s25, %s1929_s25   ;;  %s1347_s24 = sphi %s1416_s24, %s1928_s24   ;;  %s1343_s23 = sphi %s1414_s23, %s1927_s23   ;;  %s1339_s22 = sphi %s1412_s22, %s1933_s22   ;;  %s1335_s21 = sphi %s1410_s21, %s1932_s21   ;;  %s1331_s20 = sphi %s1408_s20, %s1925_s20   ;;  %s1327_s19 = sphi %s1406_s19, %s1924_s19   ;;  %s1323_s18 = sphi %s1404_s18, %s1923_s18  }
   0xa   : > { %1904 = sst [smem:[#allocation10_spill]] %s1331_s20  ;;  %s1892_s30 = sadd.s32 4294967294, %s1363_s28  }
   0xb   : > { %1905 = sst [smem:[#allocation11_spill]] %s1343_s23  ;;  %s31_s6 = sadd.s32 1, %s1355_s26 }
   0xc   : > { %1906 = sst [smem:[#allocation12_spill]] %s1355_s26  ;;  %s34_s7 = sadd.s32 1, %s1359_s27 }
   0xd   : > { %1907 = sst [smem:[#allocation13_spill]] %s1359_s27  ;;  %p32_p0 = scmp.ge.s32.totalorder %s31_s6, 4 }
   0xe   : > { %s118_s8 = sadd.s32 1, %s1343_s23  ;;  %p128_p1 = scmp.ne.s32.totalorder %s1343_s23, %s1339_s22 }
   0xf   : > { %p1468_p2 = scmp.eq.s32.totalorder %s1893_s29, 7  ;;  %s1935_s6 = smov (%p32_p0, %s31_s6), 0 }
  0x10   : > { %1909 = sst [smem:[#allocation14_spill]] %s1935_s6  ;;  %s1937_s7 = smov (!%p32_p0, %s34_s7), %s1359_s27 }
  0x11   : > { %s114_s10 = ssub.s32 %s1355_s26, %s1935_s6  ;;  %p1479_p3 = por %p1468_p2, %p128_p1 }
  0x12   : > { %p36_p4 = scmp.ge.s32.totalorder %s1937_s7, 2  ;;  %p134_p5 = scmp.ne.s32.totalorder %s1339_s22, %s1335_s21 }
  0x13   : > { %p1487_p6 = scmp.eq.s32.totalorder %s1892_s30, 7  ;;  %s144_s13 = sadd.s32 1, %s1331_s20 }
  0x14   : > { %s1939_s7 = smov (%p36_p4, %s1937_s7), 0  ;;  %p154_p8 = scmp.ne.s32.totalorder %s1331_s20, %s1327_s19 }
  0x15   : > { %1912 = sst [smem:[#allocation15_spill]] %s1939_s7  ;;  %p1496_p7 = por %p1487_p6, %p134_p5 }
  0x16   : > { %s113_s15 = ssub.s32 %s1359_s27, %s1939_s7  ;;  %p160_p9 = scmp.ne.s32.totalorder %s1327_s19, %s1323_s18 }
  0x17   : > { %s115_s16 = sor.u32 %s114_s10, %s113_s15  ;;  %p142_p10 = scmp.eq.s32.totalorder %s113_s15, 0 }
  0x18   : > { %p116_p11 = scmp.eq.s32.totalorder %s115_s16, 0  ;;  %p1508_p12 = por %p154_p8, %p1468_p2 }
  0x19   : > { %s1513_s30 = scalar_select %p142_p10, %s1331_s20, %s144_s13  }
  0x1a   : > { %s1516_s29 = scalar_select %p116_p11, %s1343_s23, %s118_s8  }
  0x1b   : > { %1915 = sst [smem:[#allocation16_spill]] %s1513_s30  ;;  %p1520_p13 = por %p160_p9, %p1487_p6 }
  0x1c   : > { %1916 = sst [smem:[#allocation17_spill]] %s1516_s29  ;;  %p972_p0 = scmp.ge.s32.totalorder %s1363_s28, 1 }
  0x1d   : > { %s1917_s6 = scalar_select %p1520_p13, 1, 0 }
  0x1e   : > { %p227_p1 = scmp.lt.s32.totalorder %s1363_s28, 9 }
  0x1f   : > { %1918 = sst [smem:[#allocation18_spill]] %s1917_s6 }
  0x20   : > { %p228_p4 = pnand %p972_p0, %p227_p1 }
  0x21   : > { %s1899_s18 = sand.u32 (!%p228_p4), 1, %s1339_s22   ;;  %s262_s9 = sand.u32 (!%p228_p4), 1, %s1327_s19  }
  0x22   : > { %231 = sbr.rel (%p228_p4) target bundleno = 352 (0x160), region = 32  ;;  %s973_s8 = sshll.u32 (!%p228_p4), %s1899_s18, 6 }
  0x23   : > { %s1531_s10 = sshll.u32 (!%p228_p4), %s1347_s24, 4  ;;  %p271_p2 = scmp.lt.s32.totalorder (!%p228_p4), %s1351_s25, 1 }
  0x24   : > { %p273_p5 = scmp.lt.s32.totalorder (!%p228_p4), %s1531_s10, 63  ;;  %s1549_s20 = scalar_lea.vmem (!%p228_p4), [#allocation2], %s973_s8 }
  0x25   : > { %s1551_s19 = scalar_lea.vmem (!%p228_p4), [#allocation4], %s262_s9  ;;  %s1553_s6 = scalar_lea.vmem (!%p228_p4), [#allocation6], %s262_s9 }
  0x26   : > { %p977_p6 = scmp.ne.s32.totalorder (!%p228_p4), %s1347_s24, 0 }
  0x29   : > { %s1536_s12 = scalar_select %p271_p2, %s1351_s25, 1 }
  0x2a   : > { %s274_s13 = scalar_select %p273_p5, %s1531_s10, 63 }
  0x2b   : > { %s975_s15 = sshll.u32 %s1536_s12, 6  ;;  %s282_s27 = scalar_lea.vmem %s1887_s1, %s1536_s12  ;;  %v1365_v0 = vmov (!%p977_p6), 0.0  }
  0x2c   : > { %s276_s26 = sadd.s32 %s975_s15, %s274_s13  ;;  %287 = sbr.rel (%p977_p6) target bundleno = 51 (0x33), region = 36  ;;  %288 = vst [vmem:[%s1551_s19] sm:$0x1] (!%p977_p6), %v1365_v0  ;;  %289 = vst [vmem:[%s1553_s6] sm:$0x1] (!%p977_p6), %v1365_v0 }
  0x2d   : > { %s976_s29 = sshll.u32 %s276_s26, 3 }
  0x2e   : > { %s1547_s30 = scalar_lea.vmem %s1886_s0, %s976_s29 }
  0x33 PF: > { %v292_v1 = vld [vmem:[%s1547_s30 + $0x10] sm:$0xff]  ;;  %v290_v2 = vld [vmem:[%s1547_s30] sm:$0xff]  ;;  %v1366_v3 = vmov 0   ;;  %v293_v4 = vld [vmem:[%s1547_s30 + $0x18] sm:$0xff]  ;;  %v1367_v18 = vmov 1   ;;  %v1368_v19 = vmov 2   ;;  %v387_v32 = vlaneseq }
  0x34   : > { %1178 = vset.pattern.permute.xlu1 %v1366_v3  ;;  %1177 = vset.pattern.permute.xlu0 %v1366_v3  ;;  %v291_v5 = vld [vmem:[%s1547_s30 + $0x8] sm:$0xff]  ;;  %v294_v7 = vld [vmem:[%s1547_s30 + $0x20] sm:$0xff]  ;;  %v297_v8 = vld [vmem:[%s1547_s30 + $0x38] sm:$0xff]  ;;  %s798_s7 = sshll.u32 %s1549_s20, 4  ;;  %s1919_s12 = sand.u32 1, %s1339_s22   ;;  %s1739_s7 = int_to_ptr.vmem [resolvable:$true] %s798_s7 }
  0x35   : > { %319 = vperm.xlu1 %1178, %v292_v1   ;;  %309 = vperm.xlu0 %1177, %v290_v2   ;;  %v295_v6 = vld [vmem:[%s1547_s30 + $0x28] sm:$0xff]  ;;  %v296_v9 = vld [vmem:[%s1547_s30 + $0x30] sm:$0xff]  ;;  %v298_v11 = vld [vmem:[%s1547_s30 + $0x40] sm:$0xff]  ;;  %v388_v35 = vshrl.u32 %v387_v32, 7  ;;  %s1749_s13 = scalar_lea.sflag [#allocation3], %s1919_s12  ;;  %s1185_s15 = scalar_lea.vmem %s1739_s7, 1024 }
  0x36   : > { %v299_v10 = vld [vmem:[%s1547_s30 + $0x48] sm:$0xff]  ;;  %v301_v12 = vld [vmem:[%s1547_s30 + $0x58] sm:$0xff]  ;;  %v300_v13 = vld [vmem:[%s1547_s30 + $0x50] sm:$0xff]  ;;  %p1186_p8 = scmp.ne.s32.totalorder %s1739_s7, %s1185_s15  ;;  %s1369_s16 = smov [#allocation2]  }
  0x37   : > { %v303_v14 = vld [vmem:[%s1547_s30 + $0x68] sm:$0xff]  ;;  %v302_v15 = vld [vmem:[%s1547_s30 + $0x60] sm:$0xff]  ;;  %v305_v16 = vld [vmem:[%s1547_s30 + $0x78] sm:$0xff]  ;;  %v473_v38 = vsub.s32 1, %v388_v35  ;;  %v573_v39 = vsub.s32 2, %v388_v35  ;;  %v389_v41 = vsub.s32 0, %v388_v35 }
  0x38   : > { %v304_v17 = vld [vmem:[%s1547_s30 + $0x70] sm:$0xff]  ;;  %v306_v40 = vld [vmem:[%s1888_s2] sm:$0x7]  ;;  %p1187_p9 = pnand %p1186_p8, %p1479_p3  ;;  %s1189_s23 = sshll.u32 %s1369_s16, 4  ;;  %s1190_s23 = int_to_ptr.vmem [resolvable:$false] %s1189_s23 }
  0x39   : > { %324 = vperm.xlu1 %1178, %v293_v4   ;;  %314 = vperm.xlu0 %1177, %v291_v5   ;;  %v1599_v42 = vrot.slane %v306_v40, %v473_v38  ;;  %v1601_v45 = vrot.slane %v306_v40, %v573_v39  ;;  %v1603_v46 = vrot.slane %v306_v40, %v389_v41  ;;  %v1617_v61 = vld [vmem:[%s282_s27] ss:$0 sm:$0xff]  ;;  %s997_s27 = sshll.u32 %s1351_s25, 6  ;;  %s1191_s24 = scalar_lea.vmem %s1190_s23, 2048 }
  0x3a   : > { %s795_s30 = sadd.s32 %s997_s27, %s1531_s10  ;;  %p1188_p10 = pneg %p1187_p9 }
  0x3b   : > { %s998_s18 = sshll.u32 %s795_s30, 6  ;;  %p1192_p11 = scmp.lt.s32.totalorder %s1739_s7, %s1190_s23 }
  0x3c   : > { %s1744_s10 = scalar_lea.hbm %s1889_s3, %s998_s18  ;;  %p1193_p0 = scmp.lt.s32.totalorder %s1191_s24, %s1185_s15 }
  0x3d   : > { %334 = vperm.xlu1 %1178, %v295_v6   ;;  %329 = vperm.xlu0 %1177, %v294_v7  }
  0x3e   : > { %p1194_p1 = por %p1193_p0, %p1192_p11 }
  0x40   : > { %p1195_p4 = pnand %p1194_p1, %p1188_p10 }
  0x41   : > { %344 = vperm.xlu1 %1178, %v297_v8   ;;  %339 = vperm.xlu0 %1177, %v296_v9  }
  0x45   : > { %354 = vperm.xlu1 %1178, %v299_v10   ;;  %349 = vperm.xlu0 %1177, %v298_v11  }
  0x49   : > { %364 = vperm.xlu1 %1178, %v301_v12   ;;  %359 = vperm.xlu0 %1177, %v300_v13  }
  0x4d   : > { %374 = vperm.xlu1 %1178, %v303_v14   ;;  %369 = vperm.xlu0 %1177, %v302_v15  }
  0x51   : > { %384 = vperm.xlu1 %1178, %v305_v16   ;;  %379 = vperm.xlu0 %1177, %v304_v17  }
  0x55   : > { %1180 = vset.pattern.permute.xlu1 %v1367_v18  ;;  %1179 = vset.pattern.permute.xlu0 %v1367_v18 }
  0x56   : > { %412 = vperm.xlu1 %1180, %v291_v5   ;;  %408 = vperm.xlu0 %1179, %v290_v2  }
  0x5a   : > { %416 = vperm.xlu1 %1180, %v292_v1   ;;  %1181 = vset.pattern.permute.xlu0 %v1368_v19 }
  0x5b   : > { %508 = vperm.xlu0 %1181, %v290_v2  }
  0x5e   : > { %1182 = vset.pattern.permute.xlu1 %v1368_v19 }
  0x5f   : > { %512 = vperm.xlu1 %1182, %v291_v5   ;;  %516 = vperm.xlu0 %1181, %v292_v1  }
  0x63   : > { %1183 = vset.pattern.permute.xlu1 %v1367_v18  ;;  %520 = vperm.xlu0 %1181, %v293_v4  }
  0x64   : > { %420 = vperm.xlu1 %1183, %v293_v4  }
  0x67   : > { %524 = vperm.xlu0 %1181, %v294_v7  }
  0x68   : > { %424 = vperm.xlu1 %1183, %v294_v7  }
  0x6b   : > { %528 = vperm.xlu0 %1181, %v295_v6  }
  0x6c   : > { %428 = vperm.xlu1 %1183, %v295_v6  }
  0x6f   : > { %532 = vperm.xlu0 %1181, %v296_v9  }
  0x70   : > { %432 = vperm.xlu1 %1183, %v296_v9  }
  0x73   : > { %536 = vperm.xlu0 %1181, %v297_v8  }
  0x74   : > { %436 = vperm.xlu1 %1183, %v297_v8  }
  0x77   : > { %540 = vperm.xlu0 %1181, %v298_v11  }
  0x78   : > { %440 = vperm.xlu1 %1183, %v298_v11  }
  0x7b   : > { %544 = vperm.xlu0 %1181, %v299_v10  }
  0x7c   : > { %444 = vperm.xlu1 %1183, %v299_v10  }
  0x7f   : > { %548 = vperm.xlu0 %1181, %v300_v13  }
  0x80   : > { %448 = vperm.xlu1 %1183, %v300_v13  }
  0x83   : > { %552 = vperm.xlu0 %1181, %v301_v12  }
  0x84   : > { %452 = vperm.xlu1 %1183, %v301_v12  }
  0x87   : > { %556 = vperm.xlu0 %1181, %v302_v15  }
  0x88   : > { %456 = vperm.xlu1 %1183, %v302_v15  }
  0x8b   : > { %560 = vperm.xlu0 %1181, %v303_v14  }
  0x8c   : > { %460 = vperm.xlu1 %1183, %v303_v14  }
  0x8f   : > { %564 = vperm.xlu0 %1181, %v304_v17  }
  0x90   : > { %464 = vperm.xlu1 %1183, %v304_v17  }
  0x94   : > { %468 = vperm.xlu1 %1183, %v305_v16  }
  0x98   : > { %1184 = vset.pattern.permute.xlu1 %v1368_v19 }
  0x99   : > { %568 = vperm.xlu1 %1184, %v305_v16  }
  0xb4   : > { %v320_v20 = vpop.permute.xlu1 %319  ;;  %v310_v21 = vpop.permute.xlu0 %309 }
  0xb5   : > { %v391_v50 = vmul.f32 %v1603_v46, %v310_v21  ;;  %v393_v63 = vmul.f32 %v1603_v46, %v320_v20 }
  0xb8   : > { %v325_v22 = vpop.permute.xlu1 %324  ;;  %v315_v23 = vpop.permute.xlu0 %314 }
  0xb9   : > { %v392_v53 = vmul.f32 %v1603_v46, %v315_v23  ;;  %v394_v5 = vmul.f32 %v1603_v46, %v325_v22 }
  0xbc   : > { %v1574_v24 = vpop.permute.xlu1 %334  ;;  %v330_v25 = vpop.permute.xlu0 %329 }
  0xbd   : > { %v395_v16 = vmul.f32 %v1603_v46, %v330_v25  ;;  %v396_v23 = vmul.f32 %v1603_v46, %v1574_v24 }
  0xc0   : > { %v1576_v26 = vpop.permute.xlu1 %344  ;;  %v1578_v27 = vpop.permute.xlu0 %339 }
  0xc4   : > { %v1580_v28 = vpop.permute.xlu1 %354  ;;  %v1582_v29 = vpop.permute.xlu0 %349 }
  0xc8   : > { %v1584_v30 = vpop.permute.xlu1 %364  ;;  %v1586_v31 = vpop.permute.xlu0 %359 }
  0xcc   : > { %v1588_v33 = vpop.permute.xlu1 %374  ;;  %v1590_v34 = vpop.permute.xlu0 %369 }
  0xd0   : > { %v1592_v36 = vpop.permute.xlu1 %384  ;;  %v1594_v37 = vpop.permute.xlu0 %379 }
  0xd5   : > { %v413_v43 = vpop.permute.xlu1 %412  ;;  %v409_v44 = vpop.permute.xlu0 %408 }
  0xd6   : > { %v475_v47 = vmul.f32 %v1599_v42, %v409_v44  ;;  %v476_v51 = vmul.f32 %v1599_v42, %v413_v43  ;;  %v397_v43 = vmul.f32 %v1603_v46, %v1578_v27 }
  0xd8   : > { %v491_v54 = vadd.f32 %v475_v47, %v391_v50  ;;  %v492_v57 = vadd.f32 %v476_v51, %v392_v53 }
  0xd9   : > { %v417_v48 = vpop.permute.xlu1 %416 }
  0xda   : > { %v509_v49 = vpop.permute.xlu0 %508  ;;  %v477_v60 = vmul.f32 %v1599_v42, %v417_v48 }
  0xdb   : > { %v575_v52 = vmul.f32 %v1601_v45, %v509_v49 }
  0xdc   : > { %v493_v6 = vadd.f32 %v477_v60, %v393_v63 }
  0xdd   : > { %v591_v58 = vadd.f32 %v575_v52, %v491_v54  ;;  %v398_v52 = vmul.f32 %v1603_v46, %v1576_v26  ;;  %v399_v26 = vmul.f32 %v1603_v46, %v1582_v29 }
  0xde   : > { %v513_v55 = vpop.permute.xlu1 %512  ;;  %v517_v56 = vpop.permute.xlu0 %516 }
  0xdf   : > { %v576_v59 = vmul.f32 %v1601_v45, %v513_v55  ;;  %v577_v0 = vmul.f32 %v1601_v45, %v517_v56  ;;  %v1622_v2 = vadd.f32 %v1617_v61, %v591_v58 }
  0xe1   : > { %v592_v62 = vadd.f32 %v576_v59, %v492_v57  ;;  %v593_v9 = vadd.f32 %v577_v0, %v493_v6 }
  0xe2   : > { %v521_v1 = vpop.permute.xlu0 %520 }
  0xe3   : > { %v1625_v3 = vadd.f32 %v1617_v61, %v592_v62  ;;  %v421_v4 = vpop.permute.xlu1 %420  ;;  %v578_v10 = vmul.f32 %v1601_v45, %v521_v1  ;;  %v1636_v17 = vadd.f32 %v1617_v61, %v593_v9 }
  0xe4   : > { %v478_v7 = vmul.f32 %v1599_v42, %v421_v4 }
  0xe5   : > { %v1022_v8 = vpack.c.bf16 %v1625_v3, %v1622_v2 }
  0xe6   : > { %v494_v11 = vadd.f32 %v478_v7, %v394_v5  ;;  %v525_v12 = vpop.permute.xlu0 %524  ;;  %v400_v7 = vmul.f32 %v1603_v46, %v1580_v28  ;;  %v401_v28 = vmul.f32 %v1603_v46, %v1586_v31  ;;  %v402_v31 = vmul.f32 %v1603_v46, %v1584_v30 }
  0xe7   : > { %1023 = vst [vmem:[%s1549_s20] sm:$0xff] %v1022_v8   ;;  %v425_v13 = vpop.permute.xlu1 %424  ;;  %v579_v32 = vmul.f32 %v1601_v45, %v525_v12  ;;  %v656_v8 = vmul.f32 %v1625_v3, %v1625_v3 }
  0xe8   : > { %v594_v14 = vadd.f32 %v578_v10, %v494_v11  ;;  %v479_v15 = vmul.f32 %v1599_v42, %v425_v13  ;;  %v655_v11 = vmul.f32 %v1622_v2, %v1622_v2 }
  0xea   : > { %v1639_v18 = vadd.f32 %v1617_v61, %v594_v14  ;;  %v529_v19 = vpop.permute.xlu0 %528  ;;  %v495_v20 = vadd.f32 %v479_v15, %v395_v16 }
  0xeb   : > { %v429_v21 = vpop.permute.xlu1 %428  ;;  %v580_v39 = vmul.f32 %v1601_v45, %v529_v19  ;;  %v631_v19 = vadd.f32 %v1625_v3, %v1622_v2 }
  0xec   : > { %v1027_v22 = vpack.c.bf16 %v1639_v18, %v1636_v17  ;;  %v480_v35 = vmul.f32 %v1599_v42, %v429_v21  ;;  %v595_v38 = vadd.f32 %v579_v32, %v495_v20  ;;  %v671_v20 = vadd.f32 %v656_v8, %v655_v11 }
  0xed   : > { %v657_v32 = vmul.f32 %v1636_v17, %v1636_v17 }
  0xee   : > { %1059 = vst [vmem:[%s1549_s20 + $0x8] sm:$0xff] %v1027_v22   ;;  %v533_v25 = vpop.permute.xlu0 %532  ;;  %v496_v40 = vadd.f32 %v480_v35, %v396_v23  ;;  %v1653_v49 = vadd.f32 %v1617_v61, %v595_v38 }
  0xef   : > { %v433_v41 = vpop.permute.xlu1 %432  ;;  %v581_v53 = vmul.f32 %v1601_v45, %v533_v25 }
  0xf0   : > { %v481_v44 = vmul.f32 %v1599_v42, %v433_v41  ;;  %v596_v47 = vadd.f32 %v580_v39, %v496_v40  ;;  %v658_v39 = vmul.f32 %v1639_v18, %v1639_v18  ;;  %v632_v40 = vadd.f32 %v631_v19, %v1636_v17 }
  0xf1   : > { %v672_v41 = vadd.f32 %v671_v20, %v657_v32 }
  0xf2   : > { %v497_v48 = vadd.f32 %v481_v44, %v397_v43  ;;  %v537_v24 = vpop.permute.xlu0 %536  ;;  %v1656_v50 = vadd.f32 %v1617_v61, %v596_v47  ;;  %v659_v44 = vmul.f32 %v1653_v49, %v1653_v49  ;;  %v633_v30 = vadd.f32 %v632_v40, %v1639_v18 }
  0xf3   : > { %v437_v51 = vpop.permute.xlu1 %436  ;;  %v582_v56 = vmul.f32 %v1601_v45, %v537_v24 }
  0xf4   : > { %v482_v27 = vmul.f32 %v1599_v42, %v437_v51  ;;  %v1032_v54 = vpack.c.bf16 %v1656_v50, %v1653_v49  ;;  %v597_v55 = vadd.f32 %v581_v53, %v497_v48  ;;  %v673_v53 = vadd.f32 %v672_v41, %v658_v39 }
  0xf6   : > { %v498_v57 = vadd.f32 %v482_v27, %v398_v52  ;;  %v541_v58 = vpop.permute.xlu0 %540  ;;  %1060 = vst [vmem:[%s1549_s20 + $0x10] sm:$0xff] %v1032_v54   ;;  %v620_v63 = vadd.f32 %v1617_v61, %v597_v55  ;;  %v660_v27 = vmul.f32 %v1656_v50, %v1656_v50  ;;  %v403_v55 = vmul.f32 %v1603_v46, %v1590_v34 }
  0xf7   : > { %v441_v59 = vpop.permute.xlu1 %440  ;;  %v583_v9 = vmul.f32 %v1601_v45, %v541_v58  ;;  %v404_v34 = vmul.f32 %v1603_v46, %v1588_v33 }
  0xf8   : > { %v598_v60 = vadd.f32 %v582_v56, %v498_v57  ;;  %v483_v62 = vmul.f32 %v1599_v42, %v441_v59  ;;  %v634_v56 = vadd.f32 %v633_v30, %v1653_v49  ;;  %v674_v57 = vadd.f32 %v673_v53, %v659_v44 }
  0xf9   : > { %v661_v58 = vmul.f32 %v620_v63, %v620_v63 }
  0xfa   : > { %v1671_v0 = vadd.f32 %v1617_v61, %v598_v60  ;;  %v545_v1 = vpop.permute.xlu0 %544  ;;  %v499_v4 = vadd.f32 %v483_v62, %v399_v26  ;;  %v635_v62 = vadd.f32 %v634_v56, %v1656_v50 }
  0xfb   : > { %v445_v5 = vpop.permute.xlu1 %444  ;;  %v584_v13 = vmul.f32 %v1601_v45, %v545_v1 }
  0xfc   : > { %v1037_v6 = vpack.c.bf16 %v1671_v0, %v620_v63  ;;  %v484_v29 = vmul.f32 %v1599_v42, %v445_v5  ;;  %v599_v12 = vadd.f32 %v583_v9, %v499_v4  ;;  %v675_v4 = vadd.f32 %v674_v57, %v660_v27 }
  0xfd   : > { %v662_v5 = vmul.f32 %v1671_v0, %v1671_v0  ;;  %v636_v49 = vadd.f32 %v635_v62, %v620_v63 }
  0xfe   : > { %1061 = vst [vmem:[%s1549_s20 + $0x18] sm:$0xff] %v1037_v6   ;;  %v549_v10 = vpop.permute.xlu0 %548  ;;  %v500_v14 = vadd.f32 %v484_v29, %v400_v7  ;;  %v622_v35 = vadd.f32 %v1617_v61, %v599_v12  ;;  %v676_v9 = vadd.f32 %v675_v4, %v661_v58 }
  0xff   : > { %v449_v15 = vpop.permute.xlu1 %448  ;;  %v585_v2 = vmul.f32 %v1601_v45, %v549_v10  ;;  %v637_v50 = vadd.f32 %v636_v49, %v1671_v0 }
 0x100   : > { %v485_v16 = vmul.f32 %v1599_v42, %v449_v15  ;;  %v600_v21 = vadd.f32 %v584_v13, %v500_v14  ;;  %v663_v29 = vmul.f32 %v622_v35, %v622_v35  ;;  %v405_v15 = vmul.f32 %v1603_v46, %v1594_v37 }
 0x101   : > { %v677_v33 = vadd.f32 %v676_v9, %v662_v5 }
 0x102   : > { %v501_v22 = vadd.f32 %v485_v16, %v401_v28  ;;  %v553_v23 = vpop.permute.xlu0 %552  ;;  %v623_v25 = vadd.f32 %v1617_v61, %v600_v21  ;;  %v638_v16 = vadd.f32 %v637_v50, %v622_v35 }
 0x103   : > { %v453_v38 = vpop.permute.xlu1 %452  ;;  %v586_v48 = vmul.f32 %v1601_v45, %v553_v23  ;;  %v678_v20 = vadd.f32 %v677_v33, %v663_v29 }
 0x104   : > { %v486_v3 = vmul.f32 %v1599_v42, %v453_v38  ;;  %v1042_v43 = vpack.c.bf16 %v623_v25, %v622_v35  ;;  %v601_v47 = vadd.f32 %v585_v2, %v501_v22  ;;  %v664_v63 = vmul.f32 %v623_v25, %v623_v25 }
 0x105   : > { %v639_v23 = vadd.f32 %v638_v16, %v623_v25 }
 0x106   : > { %v502_v24 = vadd.f32 %v486_v3, %v402_v31  ;;  %v557_v51 = vpop.permute.xlu0 %556  ;;  %1062 = vst [vmem:[%s1549_s20 + $0x20] sm:$0xff] %v1042_v43   ;;  %v624_v59 = vadd.f32 %v1617_v61, %v601_v47  ;;  %v679_v37 = vadd.f32 %v678_v20, %v664_v63  ;;  %v406_v43 = vmul.f32 %v1603_v46, %v1592_v36 }
 0x107   : > { %v457_v52 = vpop.permute.xlu1 %456  ;;  %v587_v7 = vmul.f32 %v1601_v45, %v557_v51 }
 0x108   : > { %v602_v54 = vadd.f32 %v586_v48, %v502_v24  ;;  %v487_v17 = vmul.f32 %v1599_v42, %v457_v52  ;;  %v665_v21 = vmul.f32 %v624_v59, %v624_v59  ;;  %v640_v3 = vadd.f32 %v639_v23, %v624_v59 }
 0x10a   : > { %v625_v18 = vadd.f32 %v1617_v61, %v602_v54  ;;  %v561_v60 = vpop.permute.xlu0 %560  ;;  %v503_v26 = vadd.f32 %v487_v17, %v403_v55  ;;  %v680_v41 = vadd.f32 %v679_v37, %v665_v21 }
 0x10b   : > { %v461_v1 = vpop.permute.xlu1 %460  ;;  %v588_v11 = vmul.f32 %v1601_v45, %v561_v60 }
 0x10c   : > { %v1047_v6 = vpack.c.bf16 %v625_v18, %v624_v59  ;;  %v488_v8 = vmul.f32 %v1599_v42, %v461_v1  ;;  %v603_v10 = vadd.f32 %v587_v7, %v503_v26  ;;  %v666_v39 = vmul.f32 %v625_v18, %v625_v18 }
 0x10d   : > { %v641_v25 = vadd.f32 %v640_v3, %v625_v18 }
 0x10e   : > { %1063 = vst [vmem:[%s1549_s20 + $0x28] sm:$0xff] %v1047_v6   ;;  %v504_v12 = vadd.f32 %v488_v8, %v404_v34  ;;  %v565_v13 = vpop.permute.xlu0 %564  ;;  %v626_v32 = vadd.f32 %v1617_v61, %v603_v10  ;;  %v681_v48 = vadd.f32 %v680_v41, %v666_v39 }
 0x10f   : > { %v465_v14 = vpop.permute.xlu1 %464  ;;  %v589_v0 = vmul.f32 %v1601_v45, %v565_v13 }
 0x110   : > { %v489_v28 = vmul.f32 %v1599_v42, %v465_v14  ;;  %v604_v19 = vadd.f32 %v588_v11, %v504_v12  ;;  %v667_v44 = vmul.f32 %v626_v32, %v626_v32  ;;  %v642_v51 = vadd.f32 %v641_v25, %v626_v32 }
 0x112   : > { %v505_v22 = vadd.f32 %v489_v28, %v405_v15  ;;  %v627_v38 = vadd.f32 %v1617_v61, %v604_v19 }
 0x113   : > { %v469_v31 = vpop.permute.xlu1 %468 }
 0x114   : > { %v605_v2 = vadd.f32 %v589_v0, %v505_v22  ;;  %v1052_v35 = vpack.c.bf16 %v627_v38, %v626_v32  ;;  %v490_v40 = vmul.f32 %v1599_v42, %v469_v31  ;;  %v668_v30 = vmul.f32 %v627_v38, %v627_v38 }
 0x115   : > { %v682_v42 = vadd.f32 %v681_v48, %v667_v44  ;;  %v643_v27 = vadd.f32 %v642_v51, %v627_v38 }
 0x116   : > { %1064 = vst [vmem:[%s1549_s20 + $0x30] sm:$0xff] %v1052_v35   ;;  %v628_v47 = vadd.f32 %v1617_v61, %v605_v2  ;;  %v506_v52 = vadd.f32 %v490_v40, %v406_v43 }
 0x117   : > { %v683_v46 = vadd.f32 %v682_v42, %v668_v30 }
 0x118   : > { %v569_v24 = vpop.permute.xlu1 %568  ;;  %v669_v54 = vmul.f32 %v628_v47, %v628_v47  ;;  %v644_v55 = vadd.f32 %v643_v27, %v628_v47 }
 0x119   : > { %v590_v53 = vmul.f32 %v1601_v45, %v569_v24 }
 0x11a   : > { %v684_v57 = vadd.f32 %v683_v46, %v669_v54 }
 0x11b   : > { %v606_v36 = vadd.f32 %v590_v53, %v506_v52 }
 0x11d   : > { %v629_v17 = vadd.f32 %v1617_v61, %v606_v36 }
 0x11f   : > { %v645_v56 = vadd.f32 %v644_v55, %v629_v17  ;;  %v670_v45 = vmul.f32 %v629_v17, %v629_v17  ;;  %v1057_v58 = vpack.c.bf16 %v629_v17, %v628_v47 }
 0x121   : > { %v646_v59 = vrot.slane %v645_v56, 4  ;;  %v685_v18 = vadd.f32 %v684_v57, %v670_v45  ;;  %1065 = vst [vmem:[%s1549_s20 + $0x38] sm:$0xff] %v1057_v58  }
 0x122   : > { %1198 = shalt.err (!%p1195_p4)
}
 0x123   : > { %s1199_s20 = scalar_lea.hbm %s1744_s10, 1024  ;;  %s1203_s27 = scalar_lea.hbm %s1889_s3, 8192 }
 0x124   : > { %p1200_p2 = scmp.ne.s32.totalorder %s1744_s10, %s1199_s20  ;;  %p1204_p8 = scmp.lt.u32.totalorder %s1744_s10, %s1889_s3 }
 0x125   : > { %p1205_p9 = scmp.lt.u32.totalorder %s1203_s27, %s1199_s20  ;;  %p1207_p11 = scmp.lt.u32.totalorder %s1199_s20, %s1744_s10 }
 0x126   : > { %p1201_p5 = pnand %p1200_p2, %p1479_p3 }
 0x127   : > { %p1206_p10 = por %p1205_p9, %p1204_p8 }
 0x128   : > { %p1202_p6 = pneg %p1201_p5 }
 0x129   : > { %p1208_p0 = por %p1207_p11, %p1206_p10 }
 0x12b   : > { %p1209_p1 = pnand %p1208_p0, %p1202_p6 }
 0x12d   : > { %1212 = shalt.err (!%p1209_p1)
}
 0x12e   : > { %s1370_s9 = smov 64   ;;  %s1371_s8 = smov 4   ;;  %v647_v61 = vadd.f32 %v646_v59, %v645_v56  ;;  %v686_v60 = vrot.slane %v685_v18, 4  ;;  %v630_v34 = vld [vmem:[%s1551_s19] sm:$0x1] }
 0x12f   : > { %1066 = dma.vmem_to_hbm [thread:$0]  (%p1479_p3), %s1739_s7, 1024, %s1744_s10, %s1749_s13, %s1370_s9, %s1370_s9, %s1371_s8  }
 0x130   : > { %v687_v62 = vadd.f32 %v686_v60, %v685_v18  ;;  %v648_v26 = vrot.slane %v647_v61, 2  ;;  %s1920_s12 = sadd.s32 4294967295, %s1363_s28   ;;  %s999_s16 = sshll.u32 %s1351_s25, 4  ;;  %v654_v8 = vld [vmem:[%s1553_s6] sm:$0x1] }
 0x131   : > { %s1775_s15 = sand.u32 1, %s1920_s12   ;;  %s814_s23 = sshll.u32 %s1551_s19, 4  ;;  %s1787_s23 = int_to_ptr.vmem [resolvable:$true] %s814_s23 }
 0x132   : > { %v649_v1 = vadd.f32 %v648_v26, %v647_v61  ;;  %v688_v4 = vrot.slane %v687_v62, 2  ;;  %s827_s11 = sshll.u32 %s1553_s6, 4  ;;  %s1785_s13 = scalar_lea.hbm %s1890_s4, %s999_s16  ;;  %s1795_s11 = int_to_ptr.vmem [resolvable:$true] %s827_s11 }
 0x133   : > { %s1793_s20 = scalar_lea.hbm %s1891_s5, %s999_s16  ;;  %s780_s26 = scalar_lea.sflag [#allocation5], %s1775_s15 }
 0x134   : > { %v650_v5 = vrot.slane %v649_v1, 1  ;;  %v689_v6 = vadd.f32 %v688_v4, %v687_v62  ;;  %s1213_s29 = scalar_lea.vmem %s1787_s23, 16  ;;  %s1372_s27 = smov [#allocation4]  }
 0x135   : > { %p1214_p3 = scmp.ne.s32.totalorder %s1787_s23, %s1213_s29  ;;  %s1217_s30 = sshll.u32 %s1372_s27, 4  ;;  %s1218_s30 = int_to_ptr.vmem [resolvable:$false] %s1217_s30 }
 0x136   : > { %v651_v49 = vadd.f32 %v650_v5, %v649_v1  ;;  %v690_v7 = vrot.slane %v689_v6, 1  ;;  %s1219_s18 = scalar_lea.vmem %s1218_s30, 32  ;;  %p1220_p5 = scmp.lt.s32.totalorder %s1787_s23, %s1218_s30 }
 0x137   : > { %p1215_p4 = pnand %p1214_p3, %p1508_p12  ;;  %p1221_p6 = scmp.lt.s32.totalorder %s1219_s18, %s1213_s29 }
 0x138   : > { %v652_v9 = vadd.f32 %v651_v49, %v630_v34  ;;  %v691_v29 = vadd.f32 %v690_v7, %v689_v6 }
 0x139   : > { %p1216_p2 = pneg %p1215_p4  ;;  %p1222_p8 = por %p1221_p6, %p1220_p5 }
 0x13a   : > { %653 = vst [vmem:[%s1551_s19] sm:$0x1] %v652_v9  ;;  %v692_v50 = vadd.f32 %v691_v29, %v654_v8 }
 0x13b   : > { %p1223_p9 = pnand %p1222_p8, %p1216_p2 }
 0x13d   : > { %1226 = shalt.err (!%p1223_p9)
}
 0x13e   : > { %s1227_s19 = scalar_lea.hbm %s1785_s13, 16  ;;  %s1231_s12 = scalar_lea.hbm %s1890_s4, 32 }
 0x13f   : > { %p1228_p10 = scmp.ne.s32.totalorder %s1785_s13, %s1227_s19  ;;  %p1232_p1 = scmp.lt.u32.totalorder %s1785_s13, %s1890_s4 }
 0x140   : > { %p1233_p3 = scmp.lt.u32.totalorder %s1231_s12, %s1227_s19  ;;  %p1235_p2 = scmp.lt.u32.totalorder %s1227_s19, %s1785_s13 }
 0x141   : > { %p1229_p11 = pnand %p1228_p10, %p1508_p12 }
 0x142   : > { %p1234_p4 = por %p1233_p3, %p1232_p1 }
 0x143   : > { %p1230_p0 = pneg %p1229_p11 }
 0x144   : > { %p1236_p5 = por %p1235_p2, %p1234_p4 }
 0x146   : > { %p1237_p6 = pnand %p1236_p5, %p1230_p0 }
 0x148   : > { %1240 = shalt.err (!%p1237_p6)
}
 0x149   : > { %1067 = dma.vmem_to_hbm [thread:$0]  (%p1508_p12), %s1787_s23, 16, %s1785_s13, %s780_s26   ;;  %693 = vst [vmem:[%s1553_s6] sm:$0x1] %v692_v50 }
 0x14a   : > { %s1241_s10 = scalar_lea.vmem %s1795_s11, 16  ;;  %s1373_s25 = smov [#allocation6]  }
 0x14b   : > { %p1242_p8 = scmp.ne.s32.totalorder %s1795_s11, %s1241_s10  ;;  %s1245_s24 = sshll.u32 %s1373_s25, 4  ;;  %s1246_s24 = int_to_ptr.vmem [resolvable:$false] %s1245_s24 }
 0x14c   : > { %s1247_s29 = scalar_lea.vmem %s1246_s24, 32  ;;  %p1248_p11 = scmp.lt.s32.totalorder %s1795_s11, %s1246_s24 }
 0x14d   : > { %p1243_p9 = pnand %p1242_p8, %p1508_p12  ;;  %p1249_p0 = scmp.lt.s32.totalorder %s1247_s29, %s1241_s10 }
 0x14f   : > { %p1244_p10 = pneg %p1243_p9  ;;  %p1250_p1 = por %p1249_p0, %p1248_p11 }
 0x151   : > { %p1251_p3 = pnand %p1250_p1, %p1244_p10 }
 0x153   : > { %1254 = shalt.err (!%p1251_p3)
}
 0x154   : > { %s1255_s6 = scalar_lea.hbm %s1793_s20, 16  ;;  %s1259_s27 = scalar_lea.hbm %s1891_s5, 32 }
 0x155   : > { %p1256_p4 = scmp.ne.s32.totalorder %s1793_s20, %s1255_s6  ;;  %p1260_p6 = scmp.lt.u32.totalorder %s1793_s20, %s1891_s5 }
 0x156   : > { %p1261_p8 = scmp.lt.u32.totalorder %s1259_s27, %s1255_s6  ;;  %p1263_p10 = scmp.lt.u32.totalorder %s1255_s6, %s1793_s20 }
 0x157   : > { %p1257_p2 = pnand %p1256_p4, %p1508_p12 }
 0x158   : > { %p1262_p9 = por %p1261_p8, %p1260_p6 }
 0x159   : > { %p1258_p5 = pneg %p1257_p2 }
 0x15a   : > { %p1264_p11 = por %p1263_p10, %p1262_p9 }
 0x15c   : > { %p1265_p0 = pnand %p1264_p11, %p1258_p5 }
 0x15e   : > { %1268 = shalt.err (!%p1265_p0)
}
 0x15f   : > { %1068 = dma.vmem_to_hbm [thread:$0]  (%p1508_p12), %s1795_s11, 16, %s1793_s20, %s780_s26  }
 0x160 PF: > { %p1082_p1 = scmp.ge.s32.totalorder %s1363_s28, 2  ;;  %s839_s19 = sand.u32 1, %s1335_s21  }
 0x161   : > { %s840_s9 = scalar_lea.sflag [#allocation3], %s839_s19 }
 0x162   : > { %p1073_p3 = pnand %p1082_p1, %p1496_p7 }
 0x164   : > { %1314 = dma.done.wait (!%p1073_p3), %s840_s9, 1024  }
 0x165   : > { %1316 = vsyncadd (!%p1073_p3), %s840_s9, 4294966272  ;;  %s1921_s8 = sadd.s32 4294967294, %s1363_s28   ;;  %p1076_p4 = pnand %p1082_p1, %p1520_p13 }
 0x166   : > { %s848_s17 = sand.u32 1, %s1921_s8  }
 0x167   : > { %s849_s15 = scalar_lea.sflag [#allocation5], %s848_s17 }
 0x168   : > { %1318 = dma.done.wait (!%p1076_p4), %s849_s15, 32  }
 0x169   : > { %1320 = vsyncadd (!%p1076_p4), %s849_s15, 4294967264  ;;  %s22_s28 = sadd.s32 1, %s1363_s28   ;;  %s1923_s18 = sld [smem:[#allocation9_spill]] }
 0x16a   : > { %p19_p12 = scmp.ge.s32.totalorder %s22_s28, 10   ;;  %s1924_s19 = sld [smem:[#allocation10_spill]] }
 0x16b   : > { %s1925_s20 = sld [smem:[#allocation16_spill]]  ;;  %s1926_s14 = sld [smem:[#allocation11_spill]] }
 0x16c   : > { %s1927_s23 = sld [smem:[#allocation17_spill]]  ;;  %s1928_s24 = sld [smem:[#allocation12_spill]] }
 0x16d   : > { %s1929_s25 = sld [smem:[#allocation13_spill]]  ;;  %s1930_s26 = sld [smem:[#allocation14_spill]] }
 0x16e   : > { %s1931_s27 = sld [smem:[#allocation15_spill]]  ;;  %s1932_s21 = smov %s1339_s22 }
 0x16f   :  { %21 = sbr.rel (!%p19_p12) target bundleno = 9 (0x9), region = 106 }
 0x171   : > { %s1933_s22 = smov %s1926_s14 }
 0x176   :  { %861 = vsyncpa [#allocation3], 1 }
 0x177   :  { %863 = vsyncpa [#allocation3 + $0x1], 1 }
 0x178   :  { %864 = vsyncpa [#allocation5], 1 }
 0x179   :  { %866 = vsyncpa [#allocation5 + $0x1], 1 }

</bundles_post_ra>
